<compile_context>
chip_gen: v6e
topology: v6e:2x2x1
jax: 0.10.0
libtpu: 0.0.40
codegen_flags: <defaults>
</compile_context>

<pallas_src>
import functools

import jax
import jax.numpy as jnp
from jax.experimental import pallas as pl
from jax.experimental.pallas import tpu as pltpu


def _vmem_capacity_bytes():
    """Physical per-core VMEM; conservative (v7x) fallback if query fails."""
    try:
        return int(pltpu.get_tpu_info().vmem_capacity_bytes)
    except Exception:
        return 64 << 20


def residual_linear_kernel(x_ref, wt_ref, b_ref, o_ref, *, matmul_dtype):
    # x_ref : (TM, H)  activation row tile (original dtype, streamed)
    # wt_ref: (H, H)   pre-transposed weight W.T, matmul_dtype, VMEM-resident
    # b_ref : (1, H)   bias, f32, VMEM-resident
    # o_ref : (TM, H)
    x = x_ref[...]
    # MXU matmul in bf16 (native MXU dtype), f32 accumulation.  Weight already
    # in canonical (in, out) layout -> plain dot, no in-kernel transpose.
    y = jnp.dot(x.astype(matmul_dtype), wt_ref[...],
                preferred_element_type=jnp.float32)
    # VPU epilogue in f32: bias + residual (original-precision x), single cast.
    y = y + b_ref[...] + x.astype(jnp.float32)
    o_ref[...] = y.astype(o_ref.dtype)


def _choose_row_tile(n_rows, hidden, x_itemsize, w_itemsize, vmem_cap,
                     sublane):
    """Largest row tile whose streamed buffers + resident weight fit VMEM."""
    # Resident arrays are still double-buffered by the pipeline: count 2x W
    # (matmul dtype) and 2x bias (f32).
    resident = 2 * hidden * hidden * w_itemsize + 2 * hidden * 4
    budget = int(vmem_cap * 0.75)           # headroom for Mosaic scratch/temps
    avail = budget - resident
    if avail <= 0:
        # TODO(synk): for very large hidden (weight no longer VMEM-resident,
        # earlier on v7x's 64 MiB) switch to a K-reduction grid axis with an
        # f32 VMEM scratch accumulator instead of shrinking the row tile.
        avail = 4 << 20
    # Per row of tile: double-buffered x + out tiles, plus in-kernel
    # temporaries (bf16 copy of x + f32 accumulator ~ 3 * H * 4 bytes).
    per_row = hidden * (2 * x_itemsize + 2 * x_itemsize + 12)
    tm = avail // per_row
    tm = max(sublane, min(int(tm), 1024))
    tm = (tm // sublane) * sublane

    if n_rows <= tm:
        # Enough VMEM for everything at once: still emit >= 2 grid steps when
        # there is enough work so the 'parallel' axis can use both v7x cores.
        if n_rows >= 2 * sublane:
            half = -(-((n_rows + 1) // 2) // sublane) * sublane
            return min(half, n_rows)
        return n_rows

    # Prefer a tile that divides n_rows -> last store is full-width, unmasked.
    for cand in range(tm, sublane - 1, -sublane):
        if n_rows % cand == 0:
            return cand
    return tm


def residual_linear(x2d, w, b, *, tm=None, matmul_dtype=jnp.bfloat16):
    """Fused y = x @ W.T + b + x for Residual(nn.Linear(H, H)).

    x2d: (N, H) activations; w: (out_features, in_features) PyTorch weight;
    b: (H,) bias.
    """
    N, H = x2d.shape
    assert w.shape == (H, H)

    # One-time wrapper-side cast + transpose: (out, in) -> (in, out) in the
    # MXU's native dtype.  Amortized over every row tile.
    wt = jnp.asarray(w, matmul_dtype).T
    b2d = jnp.asarray(b, jnp.float32).reshape(1, H)

    x_itemsize = jnp.dtype(x2d.dtype).itemsize
    w_itemsize = jnp.dtype(matmul_dtype).itemsize
    sublane = 16 if w_itemsize == 2 else 8
    vmem_cap = _vmem_capacity_bytes()

    if tm is None:
        tm = _choose_row_tile(N, H, x_itemsize, w_itemsize, vmem_cap, sublane)
    grid = (pl.cdiv(N, tm),)

    # VMEM request: double-buffered resident W + b, double-buffered x/out
    # tiles, in-kernel temporaries; always capped below physical capacity.
    needed = (2 * H * H * w_itemsize + 2 * H * 4
              + 2 * tm * H * x_itemsize            # x tiles
              + 2 * tm * H * x_itemsize            # out tiles
              + 3 * tm * H * 4)                    # bf16 x copy + f32 accum
    vmem_limit = int(min(max(needed + (4 << 20), 16 << 20),
                         int(vmem_cap * 0.85)))

    cost = pl.CostEstimate(
        flops=2 * N * H * H + 2 * N * H,
        transcendentals=0,
        bytes_accessed=2 * N * H * x_itemsize + H * H * w_itemsize + H * 4,
    )

    kernel = functools.partial(residual_linear_kernel,
                               matmul_dtype=matmul_dtype)
    return pl.pallas_call(
        kernel,
        out_shape=jax.ShapeDtypeStruct((N, H), x2d.dtype),
        grid=grid,
        in_specs=[
            pl.BlockSpec((tm, H), lambda i: (i, 0)),   # x: streamed row tiles
            pl.BlockSpec((H, H), lambda i: (0, 0)),    # W.T: VMEM-resident
            pl.BlockSpec((1, H), lambda i: (0, 0)),    # bias: VMEM-resident
        ],
        out_specs=pl.BlockSpec((tm, H), lambda i: (i, 0)),
        compiler_params=pltpu.CompilerParams(
            dimension_semantics=("parallel",),
            vmem_limit_bytes=vmem_limit,
        ),
        cost_estimate=cost,
    )(x2d, wt, b2d)


def residual_forward(x, w, b, *, tm=None, matmul_dtype=jnp.bfloat16):
    """Residual(nn.Linear(H, H)).forward for x of shape (batch, seq, hidden)."""
    B, S, H = x.shape
    x2d = x.reshape(B * S, H)
    out2d = residual_linear(x2d, w, b, tm=tm, matmul_dtype=matmul_dtype)
    return out2d.reshape(B, S, H)


if __name__ == "__main__":
    # Small, lane-aligned demo shape (hidden multiple of 128 -> full-width
    # stores).  Row tile is auto-chosen: N=128 rows -> 2 pipelined grid steps.
    batch, seq, hidden = 2, 64, 128

    key = jax.random.PRNGKey(0)
    kx, kw, kb = jax.random.split(key, 3)

    x = jax.random.normal(kx, (batch, seq, hidden), dtype=jnp.float32)
    w = jax.random.normal(kw, (hidden, hidden), dtype=jnp.float32) * 0.05
    b = jax.random.normal(kb, (hidden,), dtype=jnp.float32) * 0.05

    out = residual_forward(x, w, b)
    out = jax.block_until_ready(out)
    assert out.shape == (batch, seq, hidden)

    # Reference 1: same bf16-operand / f32-accumulate matmul (tight check).
    x2d = x.reshape(batch * seq, hidden)
    ref_bf16 = (jnp.dot(x2d.astype(jnp.bfloat16),
                        w.astype(jnp.bfloat16).T,
                        preferred_element_type=jnp.float32)
                + b + x2d).reshape(batch, seq, hidden)
    assert jnp.allclose(out, ref_bf16, atol=1e-3, rtol=1e-3), \
        "mismatch vs bf16 reference"

    # Reference 2: full-f32 module semantics (loose check, bf16 rounding only).
    ref_f32 = jnp.einsum("bsh,oh->bso", x, w) + b + x
    assert jnp.allclose(out, ref_f32, atol=3e-2, rtol=3e-2), \
        "mismatch vs f32 reference"

    print("KERNEL_OK")
</pallas_src>

<mosaic_0001>
module attributes {stable_mosaic.version = 11 : i64} {
  func.func @residual_linear_kernel(%arg0: i32, %arg1: memref<64x128xf32, #tpu.memory_space<vmem>>, %arg2: memref<128x128xbf16, #tpu.memory_space<vmem>>, %arg3: memref<1x128xf32, #tpu.memory_space<vmem>>, %arg4: memref<64x128xf32, #tpu.memory_space<vmem>>) attributes {dimension_semantics = [#tpu.dimension_semantics<parallel>], iteration_bounds = array<i64: 2>, scalar_prefetch = 0 : i64, scratch_operands = 0 : i64, tpu.core_type = #tpu.core_type<tc>, window_params = [{transform_indices = @transform_0, window_bounds = array<i64: 64, 128>}, {pipeline_mode = #tpu.pipeline_mode<synchronous>, transform_indices = @transform_1, window_bounds = array<i64: 128, 128>}, {pipeline_mode = #tpu.pipeline_mode<synchronous>, transform_indices = @transform_2, window_bounds = array<i64: 1, 128>}, {transform_indices = @transform_3, window_bounds = array<i64: 64, 128>}]} {
    %c0 = arith.constant 0 : index
    %c0_0 = arith.constant 0 : index
    %0 = vector.load %arg1[%c0, %c0_0] : memref<64x128xf32, #tpu.memory_space<vmem>>, vector<64x128xf32>
    %1 = arith.truncf %0 : vector<64x128xf32> to vector<64x128xbf16>
    %c0_1 = arith.constant 0 : index
    %c0_2 = arith.constant 0 : index
    %2 = vector.load %arg2[%c0_1, %c0_2] : memref<128x128xbf16, #tpu.memory_space<vmem>>, vector<128x128xbf16>
    %cst = arith.constant dense<0.000000e+00> : vector<64x128xf32>
    %3 = tpu.matmul %1, %2, %cst {dimension_numbers = #tpu.dot_dimension_numbers<[1], [0], [0], [1], [0, 0, 1, 1], [], []>} : vector<64x128xbf16>, vector<128x128xbf16>, vector<64x128xf32> -> vector<64x128xf32>
    %c0_3 = arith.constant 0 : index
    %c0_4 = arith.constant 0 : index
    %4 = vector.load %arg3[%c0_3, %c0_4] : memref<1x128xf32, #tpu.memory_space<vmem>>, vector<1x128xf32>
    %5 = vector.broadcast %4 : vector<1x128xf32> to vector<64x128xf32>
    %6 = arith.addf %3, %5 : vector<64x128xf32>
    %7 = arith.addf %6, %0 : vector<64x128xf32>
    %c0_5 = arith.constant 0 : index
    %c0_6 = arith.constant 0 : index
    %8 = vector.load %arg4[%c0_5, %c0_6] : memref<64x128xf32, #tpu.memory_space<vmem>>, vector<64x128xf32>
    tpu.vector_store %arg4[%c0_5, %c0_6], %7 {strides = array<i32>} : memref<64x128xf32, #tpu.memory_space<vmem>>, vector<64x128xf32>,
    return
  }
  func.func @transform_0(%arg0: i32) -> (i32, i32) {
    %c0_i32 = arith.constant 0 : i32
    %c0_i32_0 = arith.constant 0 : i32
    return %arg0, %c0_i32 : i32, i32
  }
  func.func @transform_1(%arg0: i32) -> (i32, i32) {
    %c0_i32 = arith.constant 0 : i32
    %c0_i32_0 = arith.constant 0 : i32
    %c0_i32_1 = arith.constant 0 : i32
    return %c0_i32, %c0_i32_0 : i32, i32
  }
  func.func @transform_2(%arg0: i32) -> (i32, i32) {
    %c0_i32 = arith.constant 0 : i32
    %c0_i32_0 = arith.constant 0 : i32
    %c0_i32_1 = arith.constant 0 : i32
    return %c0_i32, %c0_i32_0 : i32, i32
  }
  func.func @transform_3(%arg0: i32) -> (i32, i32) {
    %c0_i32 = arith.constant 0 : i32
    %c0_i32_0 = arith.constant 0 : i32
    return %arg0, %c0_i32 : i32, i32
  }
}

</mosaic_0001>

<bundles_post_ra>
// kernel: tpu_custom_call.1
= control target key start
LH: loop header
LB: loop body
LE: loop exit
PB: predicated region body
PF: predicated region fallthrough
CT: control target
= control target key end

     0   :  { %8 = vsyncpa [#allocation3], 0  ;;  %s973_s0 = inlined_call_operand.hbm [shape: f32[128,128], index: 0, kind: input, shape index: {}]   ;;  %s974_s1 = inlined_call_operand.hbm [shape: bf16[128,128], index: 1, kind: input, shape index: {}]   ;;  %s975_s2 = inlined_call_operand.vmem [shape: f32[1,128], index: 2, kind: input, shape index: {}]   ;;  %s976_s3 = inlined_call_operand.hbm [shape: f32[128,128], index: 3, kind: output, shape index: {}]  }
   0x1   :  { %10 = vsyncpa [#allocation3 + $0x1], 0 }
   0x2   :  { %11 = vsyncpa [#allocation6], 0 }
   0x3   :  { %12 = vsyncpa [#allocation4], 0 }
   0x4   :  { %14 = vsyncpa [#allocation4 + $0x1], 0  ;;  %s771_s12 = smov 0   ;;  %s773_s13 = smov 0  }
   0x5   :  { %s775_s14 = smov 0   ;;  %s777_s15 = smov 0  }
   0x6 LB: > { %s792_s16 = sadd.s32 4294967295, %s740_s15   ;;  %s468_s17 = sadd.s32 4294967294, %s740_s15   ;;  %s740_s15 = sphi %s777_s15, %s998_s15   ;;  %s736_s14 = sphi %s775_s14, %s997_s14   ;;  %s732_s13 = sphi %s773_s13, %s996_s13   ;;  %s728_s12 = sphi %s771_s12, %s995_s12  }
   0x7   : > { %p40_p0 = scmp.ne.s32.totalorder %s732_s13, %s728_s12  ;;  %p977_p1 = scmp.eq.s32.totalorder %s792_s16, 0 }
   0x8   : > { %p112_p3 = scmp.eq.s32.totalorder %s468_s17, 1  ;;  %p469_p5 = scmp.ge.s32.totalorder %s740_s15, 1 }
   0x9   : > { %p801_p4 = por %p977_p1, %p40_p0  ;;  %p119_p7 = scmp.lt.s32.totalorder %s740_s15, 3 }
   0xa   : > { %p806_p6 = por %p112_p3, %p40_p0  ;;  %s742_s21 = smov [#allocation5]  }
   0xb   : > { %s981_s18 = scalar_select %p801_p4, 1, 0 }
   0xc   : > { %s982_s19 = scalar_select %p806_p6, 1, 0 }
   0xd   : > { %p811_p8 = pnand %p469_p5, %p119_p7  ;;  %s131_s22 = sshll.u32 %s742_s21, 4  ;;  %s132_s22 = int_to_ptr.vmem [resolvable:$true] %s131_s22 }
   0xe   : > { %s825_s24 = sadd.s32 1, %s740_s15   ;;  %s27_s25 = sadd.s32 1, %s736_s14 }
   0xf   : > { %s983_s20 = scalar_select %p811_p8, 1, 0 }
  0x10   : > { %p555_p9 = pneg %p811_p8  ;;  %s24_s26 = ssub.s32 %s740_s15, %s825_s24 }
  0x11   : > { %s629_s27 = scalar_lea.vmem %s132_s22, 1024  ;;  %p637_p5 = scmp.lt.s32.totalorder %s132_s22, %s132_s22 }
  0x12   : > { %p820_p11 = pnand %p555_p9, %p977_p1  ;;  %p630_p13 = scmp.ne.s32.totalorder %s132_s22, %s629_s27 }
  0x13   : > { %p638_p7 = scmp.lt.s32.totalorder %s629_s27, %s629_s27 }
  0x14   : > { %p620_p12 = pneg %p820_p11 }
  0x15   : > { %p639_p10 = por %p638_p7, %p637_p5 }
  0x16   : > { %p632_p0 = pnand %p630_p13, %p620_p12 }
  0x18   : > { %p633_p3 = pneg %p632_p0 }
  0x1a   : > { %p640_p2 = pnand %p639_p10, %p633_p3 }
  0x1c   : > { %643 = shalt.err (!%p640_p2)
}
  0x1d   : > { %s743_s28 = smov 64   ;;  %s744_s29 = smov 4  }
  0x1e   : > { %558 = dma.hbm_to_vmem [thread:$0]  (!%p820_p11), %s974_s1, 1024, %s132_s22, [#allocation6], %s743_s28, %s743_s28, %s744_s29  }
  0x1f   : > { %p25_p9 = scmp.eq.s32.totalorder %s24_s26, 0  ;;  %p34_p12 = scmp.ne.s32.totalorder %s736_s14, %s732_s13 }
  0x20   : > { %p35_p10 = scmp.eq.s32.totalorder %s740_s15, 0  ;;  %p568_p2 = scmp.lt.s32.totalorder %s740_s15, 2 }
  0x21   : > { %s842_s5 = scalar_select %p25_p9, %s736_s14, %s27_s25  }
  0x22   : > { %p36_p13 = por %p35_p10, %p34_p12  ;;  %p985_p0 = scmp.eq.s32.totalorder %s792_s16, 1 }
  0x23   : > { %s148_s7 = sand.u32 1, %s736_s14   ;;  %s493_s8 = sshll.u32 %s740_s15, 10 }
  0x24   : > { %p846_p3 = por %p985_p0, %p34_p12  ;;  %s472_s9 = sshll.u32 %s148_s7, 6 }
  0x25   : > { %s855_s17 = scalar_lea.hbm %s973_s0, %s493_s8  ;;  %s152_s21 = scalar_lea.vmem [#allocation2], %s472_s9 }
  0x26   : > { %s986_s6 = scalar_select %p846_p3, 1, 0 }
  0x27   : > { %s159_s22 = sshll.u32 %s152_s21, 4  ;;  %p857_p11 = pnand %p568_p2, %p36_p13  ;;  %s861_s22 = int_to_ptr.vmem [resolvable:$true] %s159_s22 }
  0x28   : > { %s863_s25 = scalar_lea.sflag [#allocation3], %s148_s7  ;;  %s644_s26 = scalar_lea.hbm %s855_s17, 1024 }
  0x29   : > { %p645_p5 = scmp.ne.s32.totalorder %s855_s17, %s644_s26  ;;  %p646_p7 = pneg %p857_p11 }
  0x2a   : > { %s649_s29 = scalar_lea.hbm %s973_s0, 2048  ;;  %p650_p10 = scmp.lt.s32.totalorder %s855_s17, %s973_s0 }
  0x2b   : > { %p647_p9 = pnand %p646_p7, %p645_p5  ;;  %p651_p2 = scmp.lt.s32.totalorder %s649_s29, %s644_s26 }
  0x2d   : > { %p648_p12 = pneg %p647_p9  ;;  %p652_p13 = por %p651_p2, %p650_p10 }
  0x2f   : > { %p653_p0 = pnand %p652_p13, %p648_p12 }
  0x31   : > { %656 = shalt.err (!%p653_p0)
}
  0x32   : > { %s657_s7 = scalar_lea.vmem %s861_s22, 1024  ;;  %s745_s8 = smov [#allocation2]  }
  0x33   : > { %p658_p1 = scmp.ne.s32.totalorder %s861_s22, %s657_s7  ;;  %s662_s9 = sshll.u32 %s745_s8, 4  ;;  %s663_s9 = int_to_ptr.vmem [resolvable:$false] %s662_s9 }
  0x34   : > { %s664_s10 = scalar_lea.vmem %s663_s9, 2048  ;;  %p665_p9 = scmp.lt.s32.totalorder %s861_s22, %s663_s9 }
  0x35   : > { %p660_p6 = pnand %p658_p1, %p646_p7  ;;  %p666_p3 = scmp.lt.s32.totalorder %s664_s10, %s657_s7 }
  0x37   : > { %p661_p5 = pneg %p660_p6  ;;  %p667_p4 = por %p666_p3, %p665_p9 }
  0x39   : > { %p668_p8 = pnand %p667_p4, %p661_p5 }
  0x3b   : > { %671 = shalt.err (!%p668_p8)
}
  0x3c   : > { %s746_s11 = smov 128   ;;  %s747_s21 = smov 8  }
  0x3d   : > { %562 = dma.hbm_to_vmem [thread:$0]  (!%p857_p11), %s855_s17, 1024, %s861_s22, %s863_s25, %s746_s11, %s746_s11, %s747_s21  }
  0x3e   : > { %p988_p1 = scmp.ne.s32.totalorder %s983_s20, 0 }
  0x3f   : > { %s887_s26 = sand.u32 (!%p988_p1), 1, %s732_s13   ;;  %p989_p4 = scmp.ne.s32.totalorder (!%p988_p1), %s981_s18, 0 }
  0x40   : > { %171 = sbr.rel (%p988_p1) target bundleno = 323 (0x143), region = 32  ;;  %s476_s27 = sshll.u32 (!%p988_p1), %s887_s26, 6 }
  0x41   : > { %s174_s28 = scalar_lea.sflag (!%p988_p1), [#allocation3], %s887_s26  ;;  %s893_s29 = scalar_lea.vmem (!%p988_p1), [#allocation2], %s476_s27 }
  0x45   : > { %715 = dma.done.wait (%p989_p4), %s174_s28, 1024  }
  0x46   : > { %717 = vsyncadd (%p989_p4), %s174_s28, 4294966272  ;;  %p990_p6 = scmp.eq.s32.totalorder %s792_s16, 0 }
  0x48   : > { %719 = dma.done.wait (%p990_p6), [#allocation6], 1024   ;;  %p991_p8 = pmov %p990_p6 }
  0x49   : > { %v610_v0 = vld [vmem:[#allocation5 + $0x38] sm:$0xff]   ;;  %v611_v1 = vld [vmem:[#allocation5 + $0x30] sm:$0xff]   ;;  %v612_v2 = vld [vmem:[#allocation5 + $0x28] sm:$0xff]   ;;  %s203_s17 = scalar_lea.vmem [#allocation7], %s476_s27  ;;  %s494_s23 = sshll.u32 %s792_s16, 10 }
  0x4a   : > { %721 = vsyncadd (%p991_p8), [#allocation6], 4294966272  ;;  %507 = vmatprep.subr.bf16.mxu0 %v610_v0  ;;  %531 = vmatprep.subr.bf16.mxu1 %v610_v0  ;;  %v613_v3 = vld [vmem:[#allocation5 + $0x20] sm:$0xff]   ;;  %v905_v5 = vld [vmem:[%s893_s29 + $0x8] sm:$0xff]  ;;  %s385_s22 = sshll.u32 %s203_s17, 4  ;;  %s928_s4 = scalar_lea.hbm %s976_s3, %s494_s23  ;;  %s923_s22 = int_to_ptr.vmem [resolvable:$true] %s385_s22 }
  0x4b   : > { %508 = vmatpush3.bf16.msra.mxu0 %v610_v0  ;;  %539 = vmatpush3.bf16.msra.mxu1 %v610_v0  ;;  %v207_v4 = vld [vmem:[%s893_s29] sm:$0xff]  ;;  %v910_v8 = vld [vmem:[%s893_s29 + $0x28] sm:$0xff]  ;;  %v614_v10 = vld [vmem:[#allocation5 + $0x18] sm:$0xff]   ;;  %s372_s16 = scalar_lea.sflag [#allocation4], %s887_s26  ;;  %s672_s7 = scalar_lea.vmem %s923_s22, 1024 }
  0x4c   : > { %509 = vmatprep.subr.bf16.mxu0 %v611_v1  ;;  %532 = vmatprep.subr.bf16.mxu1 %v611_v1  ;;  %v211_v6 = vld [vmem:[%s893_s29 + $0x20] sm:$0xff]  ;;  %v215_v7 = vpack.c.bf16 %v905_v5, %v207_v4  ;;  %v615_v11 = vld [vmem:[#allocation5 + $0x10] sm:$0xff]   ;;  %v616_v12 = vld [vmem:[#allocation5 + $0x8] sm:$0xff]   ;;  %p673_p3 = scmp.ne.s32.totalorder %s923_s22, %s672_s7  ;;  %p992_p11 = scmp.ne.s32.totalorder %s986_s6, 0 }
  0x4d   : > { %v217_v9 = vpack.c.bf16 %v910_v8, %v211_v6  ;;  %v617_v13 = vld [vmem:[#allocation5] sm:$0xff]   ;;  %v209_v14 = vld [vmem:[%s893_s29 + $0x10] sm:$0xff]  ;;  %v210_v15 = vld [vmem:[%s893_s29 + $0x18] sm:$0xff]  ;;  %s748_s8 = smov [#allocation7]  }
  0x4e   : > { %523 = vmatprep.mubr.bf16.mxu0 %v215_v7  ;;  %v213_v16 = vld [vmem:[%s893_s29 + $0x30] sm:$0xff]  ;;  %v214_v17 = vld [vmem:[%s893_s29 + $0x38] sm:$0xff]  ;;  %v216_v18 = vpack.c.bf16 %v210_v15, %v209_v14  ;;  %v479_v20 = vld [vmem:[%s975_s2] ss:$0 sm:$0xff]  ;;  %p674_p7 = pnand %p673_p3, %p992_p11  ;;  %s676_s9 = sshll.u32 %s748_s8, 4  ;;  %s677_s9 = int_to_ptr.vmem [resolvable:$false] %s676_s9 }
  0x4f   : > { %510 = vmatpush3.bf16.msra.mxu0 %v611_v1  ;;  %540 = vmatpush3.bf16.msra.mxu1 %v611_v1  ;;  %v218_v19 = vpack.c.bf16 %v214_v17, %v213_v16  ;;  %s678_s10 = scalar_lea.vmem %s677_s9, 2048  ;;  %p679_p10 = scmp.lt.s32.totalorder %s923_s22, %s677_s9 }
  0x50   : > { %511 = vmatprep.subr.bf16.mxu0 %v612_v2  ;;  %533 = vmatprep.subr.bf16.mxu1 %v612_v2  ;;  %p675_p12 = pneg %p674_p7  ;;  %p680_p2 = scmp.lt.s32.totalorder %s678_s10, %s672_s7 }
  0x51   : > { %527 = vmatprep.mubr.bf16.mxu1 %v217_v9 }
  0x52   : > { %p681_p13 = por %p680_p2, %p679_p10 }
  0x53   : > { %512 = vmatpush3.bf16.msra.mxu0 %v612_v2  ;;  %541 = vmatpush3.bf16.msra.mxu1 %v612_v2 }
  0x54   : > { %513 = vmatprep.subr.bf16.mxu0 %v613_v3  ;;  %534 = vmatprep.subr.bf16.mxu1 %v613_v3  ;;  %p682_p0 = pnand %p681_p13, %p675_p12 }
  0x57   : > { %514 = vmatpush3.bf16.msra.mxu0 %v613_v3  ;;  %542 = vmatpush3.bf16.msra.mxu1 %v613_v3 }
  0x58   : > { %515 = vmatprep.subr.bf16.mxu0 %v614_v10  ;;  %535 = vmatprep.subr.bf16.mxu1 %v614_v10 }
  0x5b   : > { %516 = vmatpush3.bf16.msra.mxu0 %v614_v10  ;;  %543 = vmatpush3.bf16.msra.mxu1 %v614_v10 }
  0x5c   : > { %517 = vmatprep.subr.bf16.mxu0 %v615_v11  ;;  %536 = vmatprep.subr.bf16.mxu1 %v615_v11 }
  0x5f   : > { %518 = vmatpush3.bf16.msra.mxu0 %v615_v11  ;;  %544 = vmatpush3.bf16.msra.mxu1 %v615_v11 }
  0x60   : > { %519 = vmatprep.subr.bf16.mxu0 %v616_v12  ;;  %537 = vmatprep.subr.bf16.mxu1 %v616_v12 }
  0x63   : > { %520 = vmatpush3.bf16.msra.mxu0 %v616_v12  ;;  %545 = vmatpush3.bf16.msra.mxu1 %v616_v12 }
  0x64   : > { %521 = vmatprep.subr.bf16.mxu0 %v617_v13  ;;  %538 = vmatprep.subr.bf16.mxu1 %v617_v13 }
  0x67   : > { %522 = vmatpush3.bf16.msra.mxu0 %v617_v13  ;;  %546 = vmatpush3.bf16.msra.mxu1 %v617_v13 }
  0x6a   : > { %524 = vmatmul.mubr.bf16.vlgmr.msra.gmra.mxu0 %v216_v18  ;;  %528 = vmatmul.mubr.bf16.vlgmr.msra.gmra.mxu1 %v218_v19 }
 0x12a   : > { %v525_v21 = vpop.f32.mrf.mxu0  ;;  %v529_v22 = vpop.f32.mrf.mxu1 }
 0x12b   : > { %v333_v23 = vadd.f32 %v525_v21, %v479_v20  ;;  %v349_v24 = vadd.f32 %v529_v22, %v479_v20 }
 0x12c   : > { %v324_v25 = vpop.f32.mrf.mxu0  ;;  %v340_v26 = vpop.f32.mrf.mxu1 }
 0x12d   : > { %v357_v27 = vadd.f32 %v333_v23, %v209_v14  ;;  %v361_v28 = vadd.f32 %v349_v24, %v213_v16  ;;  %v325_v29 = vadd.f32 %v479_v20, %v324_v25  ;;  %v341_v30 = vadd.f32 %v479_v20, %v340_v26 }
 0x12e   : > { %v526_v31 = vpop.f32.mrf.mxu0  ;;  %v530_v32 = vpop.f32.mrf.mxu1 }
 0x12f   : > { %365 = vst [vmem:[%s203_s17 + $0x10] sm:$0xff] %v357_v27  ;;  %369 = vst [vmem:[%s203_s17 + $0x30] sm:$0xff] %v361_v28  ;;  %v355_v33 = vadd.f32 %v325_v29, %v207_v4  ;;  %v359_v34 = vadd.f32 %v341_v30, %v211_v6  ;;  %v336_v35 = vadd.f32 %v526_v31, %v479_v20 }
 0x130   : > { %v352_v36 = vadd.f32 %v530_v32, %v479_v20  ;;  %v327_v37 = vpop.f32.mrf.mxu0  ;;  %v343_v38 = vpop.f32.mrf.mxu1 }
 0x131   : > { %363 = vst [vmem:[%s203_s17] sm:$0xff] %v355_v33  ;;  %367 = vst [vmem:[%s203_s17 + $0x20] sm:$0xff] %v359_v34  ;;  %v358_v39 = vadd.f32 %v336_v35, %v210_v15  ;;  %v328_v41 = vadd.f32 %v479_v20, %v327_v37  ;;  %v344_v42 = vadd.f32 %v479_v20, %v343_v38 }
 0x132   : > { %v362_v40 = vadd.f32 %v352_v36, %v214_v17 }
 0x133   : > { %366 = vst [vmem:[%s203_s17 + $0x18] sm:$0xff] %v358_v39  ;;  %v356_v43 = vadd.f32 %v328_v41, %v905_v5  ;;  %v360_v44 = vadd.f32 %v344_v42, %v910_v8 }
 0x134   : > { %370 = vst [vmem:[%s203_s17 + $0x38] sm:$0xff] %v362_v40 }
 0x135   : > { %364 = vst [vmem:[%s203_s17 + $0x8] sm:$0xff] %v356_v43  ;;  %368 = vst [vmem:[%s203_s17 + $0x28] sm:$0xff] %v360_v44 }
 0x136   : > { %685 = shalt.err (!%p682_p0)
}
 0x137   : > { %s686_s11 = scalar_lea.hbm %s928_s4, 1024  ;;  %s690_s28 = scalar_lea.hbm %s976_s3, 2048 }
 0x138   : > { %p687_p5 = scmp.ne.s32.totalorder %s928_s4, %s686_s11  ;;  %p691_p4 = scmp.lt.s32.totalorder %s928_s4, %s976_s3 }
 0x139   : > { %p692_p6 = scmp.lt.s32.totalorder %s690_s28, %s686_s11 }
 0x13a   : > { %p688_p9 = pnand %p687_p5, %p992_p11 }
 0x13b   : > { %p693_p8 = por %p692_p6, %p691_p4 }
 0x13c   : > { %p689_p1 = pneg %p688_p9 }
 0x13e   : > { %p694_p3 = pnand %p693_p8, %p689_p1 }
 0x140   : > { %697 = shalt.err (!%p694_p3)
}
 0x141   : > { %s749_s20 = smov 128   ;;  %s750_s17 = smov 8  }
 0x142   : > { %553 = dma.vmem_to_hbm [thread:$0]  (%p992_p11), %s923_s22, 1024, %s928_s4, %s372_s16, %s749_s20, %s749_s20, %s750_s17  }
 0x143 PF: > { %s400_s23 = sand.u32 1, %s728_s12   ;;  %p993_p7 = scmp.ne.s32.totalorder %s982_s19, 0 }
 0x144   : > { %p994_p12 = scmp.ge.s32.totalorder %s740_s15, 2  ;;  %s401_s25 = scalar_lea.sflag [#allocation4], %s400_s23 }
 0x146   : > { %p564_p10 = pnand %p994_p12, %p993_p7 }
 0x148   : > { %p565_p2 = pneg %p564_p10 }
 0x14a   : > { %723 = dma.done.wait (%p565_p2), %s401_s25, 1024  }
 0x14b   : > { %725 = vsyncadd (%p565_p2), %s401_s25, 4294966272  ;;  %p17_p13 = scmp.ge.s32.totalorder %s825_s24, 4   ;;  %s995_s12 = smov %s732_s13 }
 0x14c   : > { %s996_s13 = smov %s736_s14  ;;  %s997_s14 = smov %s842_s5 }
 0x14d   : > { %s998_s15 = smov %s825_s24  ;;  %19 = sbr.rel (!%p17_p13) target bundleno = 6 (0x6), region = 81 }
 0x152   :  { %406 = vsyncpa [#allocation3], 1 }
 0x153   :  { %408 = vsyncpa [#allocation3 + $0x1], 1 }
 0x154   :  { %409 = vsyncpa [#allocation6], 1 }
 0x155   :  { %410 = vsyncpa [#allocation4], 1 }
 0x156   :  { %412 = vsyncpa [#allocation4 + $0x1], 1 }

</bundles_post_ra>
